<compile_context>
chip_gen: v7x
topology: tpu7x:2x2x1
jax: 0.10.0
libtpu: 0.0.40
codegen_flags: <defaults>
</compile_context>

<pallas_src>
import jax
import jax.numpy as jnp
from jax.experimental import pallas as pl
from jax.experimental.pallas import tpu as pltpu


def mlp_kernel(x_ref, w1t_ref, b1_ref, w2_ref, b2_ref, o_ref):
    # fc1: (B, K) bf16 x lane-dense (H, K) bf16, contracted over K (trans_b),
    # f32 accumulation on the MXU.
    h = jax.lax.dot_general(
        x_ref[...], w1t_ref[...],
        dimension_numbers=(((1,), (1,)), ((), ())),
        preferred_element_type=jnp.float32)                      # (B, H) f32
    h = jnp.maximum(h + b1_ref[...], 0.0)                        # bias + ReLU in f32
    # dropout(p=0.5) is identity in eval mode.
    # fc2 stays in f32 (no bf16 round-trip of activations); (B,H)@(H,C) is tiny.
    out = jnp.dot(h, w2_ref[...], preferred_element_type=jnp.float32) + b2_ref[...]
    o_ref[...] = out


def prepare_params(emb_table, w1, b1, w2, b2):
    """One-time parameter preprocessing.

    Keeps all casts / transposes out of the per-call forward path:
      - embedding table stored in bf16 (gather yields bf16 x with no extra cast op)
      - w1 stored transposed (H, K) in bf16 -> lane-dense VMEM block + dense DMA
      - fc2 weight/biases kept in f32 (activations never drop to bf16 after fc1)
    """
    return dict(
        emb_bf=emb_table.astype(jnp.bfloat16),
        w1t_bf=jnp.asarray(w1.T, dtype=jnp.bfloat16),   # (H, K) = (32, 3200)
        b1_row=b1.reshape(1, -1).astype(jnp.float32),   # (1, H)
        w2_f32=w2.astype(jnp.float32),                  # (H, C)
        b2_row=b2.reshape(1, -1).astype(jnp.float32),   # (1, C)
    )


@jax.jit
def mlp_forward(token_ids, emb_bf, w1t_bf, b1_row, w2_f32, b2_row):
    """token_ids: (B, SEQ) int32.  Returns logits (B, num_classes) float32."""
    B, SEQ = token_ids.shape
    E = emb_bf.shape[1]
    K = SEQ * E
    H = w1t_bf.shape[0]
    C = w2_f32.shape[1]
    assert w1t_bf.shape == (H, K)

    # Embedding lookup (padding_idx=0 row is zero in the table) + flatten, in
    # bf16 directly; under jit this fuses with the pallas_call dispatch.
    x = emb_bf[token_ids].reshape(B, K)

    flops = 2 * B * K * H + 2 * B * H * C
    bytes_accessed = (x.size * 2 + w1t_bf.size * 2 + b1_row.size * 4
                      + w2_f32.size * 4 + b2_row.size * 4 + B * C * 4)

    vmem = pl.BlockSpec(memory_space=pltpu.MemorySpace.VMEM)
    return pl.pallas_call(
        mlp_kernel,
        out_shape=jax.ShapeDtypeStruct((B, C), jnp.float32),
        in_specs=[vmem] * 5,      # whole arrays resident in VMEM, single invocation:
        out_specs=vmem,           # no grid, no pipelining, no double buffering
        cost_estimate=pl.CostEstimate(flops=flops, transcendentals=0,
                                      bytes_accessed=bytes_accessed),
    )(x, w1t_bf, b1_row, w2_f32, b2_row)


if __name__ == "__main__":
    # Small shapes consistent with the module: seq length is fixed at 200 by
    # fc1's input dim (embedding_dim * 200).
    vocab_size = 100
    embedding_dim = 16
    hidden_dim = 32
    num_classes = 2
    seq_len = 200
    batch = 2

    key = jax.random.PRNGKey(0)
    k_emb, k_w1, k_b1, k_w2, k_b2, k_ids = jax.random.split(key, 6)

    emb_table = jax.random.normal(k_emb, (vocab_size, embedding_dim),
                                  dtype=jnp.float32) * 0.1
    emb_table = emb_table.at[0].set(0.0)     # padding_idx=0

    in_dim = embedding_dim * seq_len         # 3200
    w1 = jax.random.normal(k_w1, (in_dim, hidden_dim), dtype=jnp.float32) * 0.02
    b1 = jax.random.normal(k_b1, (hidden_dim,), dtype=jnp.float32) * 0.02
    w2 = jax.random.normal(k_w2, (hidden_dim, num_classes), dtype=jnp.float32) * 0.02
    b2 = jax.random.normal(k_b2, (num_classes,), dtype=jnp.float32) * 0.02

    token_ids = jax.random.randint(k_ids, (batch, seq_len), 0, vocab_size,
                                   dtype=jnp.int32)

    # One-time parameter prep (casts / transpose) -- NOT in the forward path.
    params = prepare_params(emb_table, w1, b1, w2, b2)

    logits = mlp_forward(token_ids, params["emb_bf"], params["w1t_bf"],
                         params["b1_row"], params["w2_f32"], params["b2_row"])
    logits = jax.block_until_ready(logits)
    assert logits.shape == (batch, num_classes)

    # Pure-JAX reference with matching bf16 fc1 operands + f32 fc2.
    x_bf = params["emb_bf"][token_ids].reshape(batch, -1)
    h_ref = jnp.maximum(
        jax.lax.dot_general(x_bf, params["w1t_bf"],
                            dimension_numbers=(((1,), (1,)), ((), ())),
                            preferred_element_type=jnp.float32) + b1, 0.0)
    ref_bf = jnp.dot(h_ref, w2) + b2
    assert jnp.allclose(logits, ref_bf, atol=1e-3, rtol=1e-3)

    # Loose sanity check against the full-f32 forward (bf16 rounding only).
    x_f32 = emb_table[token_ids].reshape(batch, -1)
    ref_f32 = jnp.maximum(x_f32 @ w1 + b1, 0.0) @ w2 + b2
    assert jnp.allclose(logits, ref_f32, atol=5e-2, rtol=5e-2)

    print("KERNEL_OK")
</pallas_src>

<mosaic_0001>
module attributes {stable_mosaic.version = 11 : i64} {
  func.func @mlp_kernel(%arg0: memref<2x3200xbf16, #tpu.memory_space<vmem>>, %arg1: memref<32x3200xbf16, #tpu.memory_space<vmem>>, %arg2: memref<1x32xf32, #tpu.memory_space<vmem>>, %arg3: memref<32x2xf32, #tpu.memory_space<vmem>>, %arg4: memref<1x2xf32, #tpu.memory_space<vmem>>, %arg5: memref<2x2xf32, #tpu.memory_space<vmem>>) attributes {dimension_semantics = [], scalar_prefetch = 0 : i64, scratch_operands = 0 : i64, tpu.core_type = #tpu.core_type<tc>} {
    %c0 = arith.constant 0 : index
    %c0_0 = arith.constant 0 : index
    %0 = vector.load %arg0[%c0, %c0_0] : memref<2x3200xbf16, #tpu.memory_space<vmem>>, vector<2x3200xbf16>
    %c0_1 = arith.constant 0 : index
    %c0_2 = arith.constant 0 : index
    %1 = vector.load %arg1[%c0_1, %c0_2] : memref<32x3200xbf16, #tpu.memory_space<vmem>>, vector<32x3200xbf16>
    %cst = arith.constant dense<0.000000e+00> : vector<2x32xf32>
    %2 = tpu.matmul %0, %1, %cst {dimension_numbers = #tpu.dot_dimension_numbers<[1], [1], [0], [0], [0, 0, 1, 0], [], []>} : vector<2x3200xbf16>, vector<32x3200xbf16>, vector<2x32xf32> -> vector<2x32xf32>
    %c0_3 = arith.constant 0 : index
    %c0_4 = arith.constant 0 : index
    %3 = vector.load %arg2[%c0_3, %c0_4] : memref<1x32xf32, #tpu.memory_space<vmem>>, vector<1x32xf32>
    %4 = vector.broadcast %3 : vector<1x32xf32> to vector<2x32xf32>
    %5 = arith.addf %2, %4 : vector<2x32xf32>
    %cst_5 = arith.constant 0.000000e+00 : f32
    %6 = vector.broadcast %cst_5 : f32 to vector<2x32xf32>
    %7 = arith.maximumf %5, %6 : vector<2x32xf32>
    %c0_6 = arith.constant 0 : index
    %c0_7 = arith.constant 0 : index
    %8 = vector.load %arg3[%c0_6, %c0_7] : memref<32x2xf32, #tpu.memory_space<vmem>>, vector<32x2xf32>
    %cst_8 = arith.constant dense<0.000000e+00> : vector<2x2xf32>
    %9 = tpu.matmul %7, %8, %cst_8 {dimension_numbers = #tpu.dot_dimension_numbers<[1], [0], [0], [1], [0, 0, 1, 1], [], []>} : vector<2x32xf32>, vector<32x2xf32>, vector<2x2xf32> -> vector<2x2xf32>
    %c0_9 = arith.constant 0 : index
    %c0_10 = arith.constant 0 : index
    %10 = vector.load %arg4[%c0_9, %c0_10] : memref<1x2xf32, #tpu.memory_space<vmem>>, vector<1x2xf32>
    %11 = vector.broadcast %10 : vector<1x2xf32> to vector<2x2xf32>
    %12 = arith.addf %9, %11 : vector<2x2xf32>
    %c0_11 = arith.constant 0 : index
    %c0_12 = arith.constant 0 : index
    %13 = vector.load %arg5[%c0_11, %c0_12] : memref<2x2xf32, #tpu.memory_space<vmem>>, vector<2x2xf32>
    tpu.vector_store %arg5[%c0_11, %c0_12], %12 {strides = array<i32>} : memref<2x2xf32, #tpu.memory_space<vmem>>, vector<2x2xf32>,
    return
  }
}

</mosaic_0001>

<bundles_post_ra>
// kernel: mlp_forward.1
= control target key start
LH: loop header
LB: loop body
LE: loop exit
PB: predicated region body
PF: predicated region fallthrough
CT: control target
= control target key end

     0   :  { %v93_v1 = vlaneseq  ;;  %v1388_v3 = vmov 1966171168   ;;  %s1641_s0 = inlined_call_operand.vmem [shape: bf16[2,3200], index: 0, kind: input, shape index: {}]   ;;  %s1642_s1 = inlined_call_operand.vmem [shape: bf16[32,3200], index: 1, kind: input, shape index: {}]   ;;  %s1643_s2 = inlined_call_operand.vmem [shape: f32[1,32], index: 2, kind: input, shape index: {}]   ;;  %s1644_s3 = inlined_call_operand.vmem [shape: f32[32,2], index: 3, kind: input, shape index: {}]   ;;  %s1645_s4 = inlined_call_operand.vmem [shape: f32[1,2], index: 4, kind: input, shape index: {}]   ;;  %s1646_s5 = inlined_call_operand.hbm [shape: f32[2,2], index: 5, kind: output, shape index: {}]  }
   0x1   :  { %v1287_v0 = vld [vmem:[%s1642_s1 + $0x4] ss:$100 sps:$4 sm:$0xff]   ;;  %v1289_v2 = vld [vmem:[%s1642_s1 + $0x34] ss:$100 sps:$4 sm:$0xff]   ;;  %v91_v4 = vunpack.c.l.s4 %v1388_v3  ;;  %v1293_v8 = vld [vmem:[%s1642_s1 + $0xcc] ss:$100 sps:$4 sm:$0xff]  }
   0x2   :  { %527 = vmatprep.subr.bf16.mxu1 %v1287_v0  ;;  %v1291_v5 = vld [vmem:[%s1642_s1] ss:$100 sps:$4 sm:$0xff]   ;;  %v1292_v6 = vld [vmem:[%s1642_s1 + $0x30] ss:$100 sps:$4 sm:$0xff]   ;;  %v94_v7 = vshrl.u32 %v93_v1, 7  ;;  %767 = vmatprep.subr.bf16.mxu0 %v1289_v2  ;;  %v1450_v14 = vld [vmem:[%s1641_s0 + $0x8] sm:$0xff] }
   0x3   :  { %v92_v9 = vunpack.c.0.s8 %v91_v4  ;;  %528 = vmatpush1.bf16.xpose.msra.mxu1 %v1291_v5  ;;  %768 = vmatpush1.bf16.xpose.msra.mxu0 %v1292_v6  ;;  %v1295_v10 = vld [vmem:[%s1642_s1 + $0xfc] ss:$100 sps:$4 sm:$0xff]   ;;  %v1297_v15 = vld [vmem:[%s1642_s1 + $0xc8] ss:$100 sps:$4 sm:$0xff]   ;;  %v138_v17 = vcombine.high %v1450_v14, %v1450_v14  ;;  %v1309_v29 = vld [vmem:[%s1642_s1 + $0xd4] ss:$100 sps:$4 sm:$0xff]  }
   0x4   :  { %529 = vmatprep.subr.bf16.mxu1 %v1293_v8  ;;  %v22_v11 = vld [vmem:[%s1641_s0] sm:$0xff]  ;;  %769 = vmatprep.subr.bf16.mxu0 %v1295_v10  ;;  %v1298_v16 = vld [vmem:[%s1642_s1 + $0xf8] ss:$100 sps:$4 sm:$0xff]   ;;  %v1302_v19 = vld [vmem:[%s1642_s1 + $0xc] ss:$100 sps:$4 sm:$0xff]  }
   0x5   :  { %v1444_v12 = vsub.s32 %v92_v9, %v94_v7  ;;  %v1306_v21 = vld [vmem:[%s1642_s1 + $0x3c] ss:$100 sps:$4 sm:$0xff]   ;;  %v1300_v27 = vld [vmem:[%s1642_s1 + $0x8] ss:$100 sps:$4 sm:$0xff]   ;;  %v89_v33 = vcombine.high %v22_v11, %v22_v11  ;;  %v1307_v34 = vld [vmem:[%s1642_s1 + $0xd0] ss:$100 sps:$4 sm:$0xff]  }
   0x6   :  { %v1304_v28 = vld [vmem:[%s1642_s1 + $0x38] ss:$100 sps:$4 sm:$0xff]   ;;  %v1312_v30 = vld [vmem:[%s1642_s1 + $0x104] ss:$100 sps:$4 sm:$0xff]   ;;  %v24_v35 = vld [vmem:[%s1641_s0 + $0x10] sm:$0xff] }
   0x7   :  { %v96_v13 = vrot.slane %v22_v11, %v1444_v12  ;;  %v152_v20 = vrot.slane %v138_v17, %v1444_v12  ;;  %v1310_v36 = vld [vmem:[%s1642_s1 + $0x100] ss:$100 sps:$4 sm:$0xff]   ;;  %v1315_v37 = vld [vmem:[%s1642_s1 + $0x14] ss:$100 sps:$4 sm:$0xff]   ;;  %v103_v39 = vrot.slane %v89_v33, %v1444_v12  ;;  %v194_v40 = vrot.slane %v24_v35, %v1444_v12  ;;  %v1324_v48 = vld [vmem:[%s1642_s1 + $0x10c] ss:$100 sps:$4 sm:$0xff]  }
   0x8   :  { %v1318_v38 = vld [vmem:[%s1642_s1 + $0x44] ss:$100 sps:$4 sm:$0xff]   ;;  %v1313_v45 = vld [vmem:[%s1642_s1 + $0x10] ss:$100 sps:$4 sm:$0xff]   ;;  %v1321_v47 = vld [vmem:[%s1642_s1 + $0xdc] ss:$100 sps:$4 sm:$0xff]  }
   0x9   :  { %v104_v18 = vcombine.high %v96_v13, %v96_v13  ;;  %v154_v23 = vcombine.high %v152_v20, %v152_v20  ;;  %v112_v25 = vrot.slane %v96_v13, %v1444_v12  ;;  %v168_v26 = vrot.slane %v152_v20, %v1444_v12  ;;  %v1316_v46 = vld [vmem:[%s1642_s1 + $0x40] ss:$100 sps:$4 sm:$0xff]  }
   0xa   :  { %v105_v41 = vcombine.high %v103_v39, %v103_v39  ;;  %v202_v42 = vcombine.high %v194_v40, %v194_v40 }
   0xb   :  { %v126_v22 = vrot.slane %v104_v18, %v1444_v12  ;;  %530 = vmatpush1.bf16.xpose.msra.mxu1 %v1297_v15  ;;  %770 = vmatpush1.bf16.xpose.msra.mxu0 %v1298_v16  ;;  %v182_v24 = vrot.slane %v154_v23, %v1444_v12  ;;  %v134_v43 = vcombine.high %v112_v25, %v112_v25 }
   0xc   :  { %567 = vmatprep.subr.bf16.mxu1 %v1302_v19  ;;  %807 = vmatprep.subr.bf16.mxu0 %v1306_v21  ;;  %v184_v44 = vcombine.high %v168_v26, %v168_v26  ;;  %v133_v49 = vrot.slane %v105_v41, %v1444_v12  ;;  %v224_v50 = vrot.slane %v202_v42, %v1444_v12 }
   0xd   :  { %559 = vmatprep.mubr.bf16.mxu1 %v126_v22  ;;  %799 = vmatprep.mubr.bf16.mxu0 %v182_v24  ;;  %v136_v31 = vcombine.high %v126_v22, %v126_v22  ;;  %v186_v32 = vcombine.high %v182_v24, %v182_v24 }
  0x12   :  { %560 = vmatmul.mubr.bf16.vlgmr.msra.gmra.mrb[0].mxu1 %v112_v25  ;;  %800 = vmatmul.mubr.bf16.vlgmr.msra.gmra.mrb[0].mxu0 %v168_v26 }
  0x13   :  { %568 = vmatpush1.bf16.xpose.msra.mxu1 %v1300_v27  ;;  %808 = vmatpush1.bf16.xpose.msra.mxu0 %v1304_v28 }
  0x14   :  { %569 = vmatprep.subr.bf16.mxu1 %v1309_v29  ;;  %809 = vmatprep.subr.bf16.mxu0 %v1312_v30 }
  0x15   :  { %599 = vmatprep.mubr.bf16.mxu1 %v136_v31  ;;  %839 = vmatprep.mubr.bf16.mxu0 %v186_v32 }
  0x1b   :  { %570 = vmatpush1.bf16.xpose.msra.mxu1 %v1307_v34  ;;  %810 = vmatpush1.bf16.xpose.msra.mxu0 %v1310_v36 }
  0x1c   :  { %607 = vmatprep.subr.bf16.mxu1 %v1315_v37  ;;  %847 = vmatprep.subr.bf16.mxu0 %v1318_v38 }
  0x22   :  { %600 = vmatmul.mubr.bf16.vlgmr.msra.gmra.mrb[0].mxu1 %v134_v43  ;;  %840 = vmatmul.mubr.bf16.vlgmr.msra.gmra.mrb[0].mxu0 %v184_v44 }
  0x23   :  { %608 = vmatpush1.bf16.xpose.msra.mxu1 %v1313_v45  ;;  %848 = vmatpush1.bf16.xpose.msra.mxu0 %v1316_v46 }
  0x24   :  { %10 = vsyncpa [#allocation3], 0  ;;  %609 = vmatprep.subr.bf16.mxu1 %v1321_v47  ;;  %849 = vmatprep.subr.bf16.mxu0 %v1324_v48  ;;  %v1319_v51 = vld [vmem:[%s1642_s1 + $0xd8] ss:$100 sps:$4 sm:$0xff]   ;;  %v1322_v52 = vld [vmem:[%s1642_s1 + $0x108] ss:$100 sps:$4 sm:$0xff]   ;;  %v119_v55 = vrot.slane %v103_v39, %v1444_v12  ;;  %v210_v56 = vrot.slane %v194_v40, %v1444_v12  ;;  %v137_v61 = vcombine.high %v133_v49, %v133_v49 }
  0x25   :  { %639 = vmatprep.mubr.bf16.mxu1 %v133_v49  ;;  %879 = vmatprep.mubr.bf16.mxu0 %v224_v50  ;;  %v1327_v53 = vld [vmem:[%s1642_s1 + $0x1c] ss:$100 sps:$4 sm:$0xff]   ;;  %v1330_v54 = vld [vmem:[%s1642_s1 + $0x4c] ss:$100 sps:$4 sm:$0xff]   ;;  %v1333_v59 = vld [vmem:[%s1642_s1 + $0xe4] ss:$100 sps:$4 sm:$0xff]   ;;  %v234_v62 = vcombine.high %v224_v50, %v224_v50  ;;  %v187_v63 = vcombine.high %v24_v35, %v24_v35  ;;  %v145_v4 = vrot.slane %v1450_v14, %v1444_v12 }
  0x26   :  { %v1325_v57 = vld [vmem:[%s1642_s1 + $0x18] ss:$100 sps:$4 sm:$0xff]   ;;  %v1328_v58 = vld [vmem:[%s1642_s1 + $0x48] ss:$100 sps:$4 sm:$0xff]   ;;  %v1331_v0 = vld [vmem:[%s1642_s1 + $0xe0] ss:$100 sps:$4 sm:$0xff]   ;;  %v135_v8 = vcombine.high %v119_v55, %v119_v55  ;;  %v232_v9 = vcombine.high %v210_v56, %v210_v56 }
  0x27   :  { %v1336_v60 = vld [vmem:[%s1642_s1 + $0x114] ss:$100 sps:$4 sm:$0xff]   ;;  %v1339_v2 = vld [vmem:[%s1642_s1 + $0x24] ss:$100 sps:$4 sm:$0xff]   ;;  %v201_v5 = vrot.slane %v187_v63, %v1444_v12  ;;  %v153_v6 = vcombine.high %v145_v4, %v145_v4  ;;  %v1345_v13 = vld [vmem:[%s1642_s1 + $0xec] ss:$100 sps:$4 sm:$0xff]   ;;  %v161_v21 = vrot.slane %v145_v4, %v1444_v12 }
  0x28   :  { %v1334_v1 = vld [vmem:[%s1642_s1 + $0x110] ss:$100 sps:$4 sm:$0xff]   ;;  %v1337_v10 = vld [vmem:[%s1642_s1 + $0x20] ss:$100 sps:$4 sm:$0xff]   ;;  %v1343_v17 = vld [vmem:[%s1642_s1 + $0xe8] ss:$100 sps:$4 sm:$0xff]  }
  0x29   :  { %v1342_v3 = vld [vmem:[%s1642_s1 + $0x54] ss:$100 sps:$4 sm:$0xff]   ;;  %v203_v7 = vcombine.high %v201_v5, %v201_v5  ;;  %v1348_v14 = vld [vmem:[%s1642_s1 + $0x11c] ss:$100 sps:$4 sm:$0xff]   ;;  %v175_v15 = vrot.slane %v153_v6, %v1444_v12  ;;  %v1351_v19 = vld [vmem:[%s1642_s1 + $0x2c] ss:$100 sps:$4 sm:$0xff]   ;;  %v217_v22 = vrot.slane %v201_v5, %v1444_v12  ;;  %v183_v32 = vcombine.high %v161_v21, %v161_v21 }
  0x2a   :  { %v1340_v11 = vld [vmem:[%s1642_s1 + $0x50] ss:$100 sps:$4 sm:$0xff]   ;;  %v1346_v18 = vld [vmem:[%s1642_s1 + $0x118] ss:$100 sps:$4 sm:$0xff]   ;;  %v1349_v23 = vld [vmem:[%s1642_s1 + $0x28] ss:$100 sps:$4 sm:$0xff]  }
  0x2b   :  { %610 = vmatpush1.bf16.xpose.msra.mxu1 %v1319_v51  ;;  %850 = vmatpush1.bf16.xpose.msra.mxu0 %v1322_v52  ;;  %v231_v16 = vrot.slane %v203_v7, %v1444_v12  ;;  %v1355_v20 = vld [vmem:[%s1642_s1 + $0x5c] ss:$100 sps:$4 sm:$0xff]   ;;  %v1358_v25 = vld [vmem:[%s1642_s1 + $0xf4] ss:$100 sps:$4 sm:$0xff]   ;;  %v1361_v26 = vld [vmem:[%s1642_s1 + $0x124] ss:$100 sps:$4 sm:$0xff]   ;;  %v185_v27 = vcombine.high %v175_v15, %v175_v15  ;;  %v233_v33 = vcombine.high %v217_v22, %v217_v22 }
  0x2c   :  { %647 = vmatprep.subr.bf16.mxu1 %v1327_v53  ;;  %887 = vmatprep.subr.bf16.mxu0 %v1330_v54  ;;  %v1353_v24 = vld [vmem:[%s1642_s1 + $0x58] ss:$100 sps:$4 sm:$0xff]   ;;  %v1356_v29 = vld [vmem:[%s1642_s1 + $0xf0] ss:$100 sps:$4 sm:$0xff]   ;;  %v1359_v30 = vld [vmem:[%s1642_s1 + $0x120] ss:$100 sps:$4 sm:$0xff]  }
  0x2d   :  { %v235_v28 = vcombine.high %v231_v16, %v231_v16  ;;  %v1389_v31 = vmov 0.0   ;;  %v1362_v34 = vld [vmem:[%s1642_s1 + $0x60] ss:$100 sps:$4 sm:$0xff]   ;;  %vm1390_vm0 = vmmov 0   ;;  %v1363_v35 = vld [vmem:[%s1642_s1 + $0x128] ss:$100 sps:$4 sm:$0xff]  }
  0x2e   :  { %v1150_v36 = vld.sshfl [vmem:[%s1641_s0 + $0x18] sm:$0x1 pattern:$0x75316420]  ;;  %v1048_v38 = vld [vmem:[%s1644_s3] sm:$0xff]  ;;  %v1049_v39 = vld [vmem:[%s1644_s3 + $0x8] sm:$0xff] }
  0x2f   :  { %v249_v37 = vrot.slane %v1150_v36, %v1444_v12  ;;  %v1391_v40 = vmov 0.0|0.0   ;;  %v1231_v41 = vpack.c.bf16 %v1049_v39, %v1048_v38  ;;  %v1050_v42 = vld [vmem:[%s1644_s3 + $0x10] sm:$0xff]  ;;  %v1051_v12 = vld [vmem:[%s1644_s3 + $0x18] sm:$0xff]  ;;  %v1149_v48 = vld [vmem:[%s1643_s2] ss:$0 sm:$0xff]  ;;  %vm1059_vm1 = vcmask 261120  }
  0x30   :  { %v1234_v43 = vpack.c.bf16 %v1051_v12, %v1050_v42  ;;  %s1392_s10 = smov [#allocation2]   ;;  %vm1133_vm2 = vcmask 9216  }
  0x31   :  { %s1141_s11 = sshll.u32 %s1392_s10, 4  ;;  %s1142_s11 = int_to_ptr.vmem [resolvable:$true] %s1141_s11 }
  0x32   :  { %640 = vmatmul.mubr.bf16.vlgmr.msra.gmra.mrb[0].mxu1 %v119_v55  ;;  %880 = vmatmul.mubr.bf16.vlgmr.msra.gmra.mrb[0].mxu0 %v210_v56  ;;  %v1201_v56 = vld [vmem:[%s1645_s4] ss:$0 sm:$0xff]  ;;  %s1364_s2 = scalar_lea.vmem %s1142_s11, 32  ;;  %p1369_p1 = scmp.lt.s32.totalorder %s1142_s11, %s1142_s11 }
  0x33   :  { %648 = vmatpush1.bf16.xpose.msra.mxu1 %v1325_v57  ;;  %888 = vmatpush1.bf16.xpose.msra.mxu0 %v1328_v58  ;;  %p1365_p0 = scmp.ne.s32.totalorder %s1142_s11, %s1364_s2  ;;  %p1370_p2 = scmp.lt.s32.totalorder %s1364_s2, %s1364_s2 }
  0x34   :  { %649 = vmatprep.subr.bf16.mxu1 %v1333_v59  ;;  %889 = vmatprep.subr.bf16.mxu0 %v1336_v60 }
  0x35   :  { %679 = vmatprep.mubr.bf16.mxu1 %v137_v61  ;;  %919 = vmatprep.mubr.bf16.mxu0 %v234_v62  ;;  %p1371_p3 = por %p1370_p2, %p1369_p1 }
  0x37   :  { %p1372_p4 = pnand %p1371_p3, %p1365_p0 }
  0x3b   :  { %650 = vmatpush1.bf16.xpose.msra.mxu1 %v1331_v0  ;;  %890 = vmatpush1.bf16.xpose.msra.mxu0 %v1334_v1 }
  0x3c   :  { %687 = vmatprep.subr.bf16.mxu1 %v1339_v2  ;;  %927 = vmatprep.subr.bf16.mxu0 %v1342_v3 }
  0x42   :  { %680 = vmatmul.mubr.bf16.vlgmr.msra.gmra.mrb[0].mxu1 %v135_v8  ;;  %920 = vmatmul.mubr.bf16.vlgmr.msra.gmra.mrb[0].mxu0 %v232_v9 }
  0x43   :  { %688 = vmatpush1.bf16.xpose.msra.mxu1 %v1337_v10  ;;  %928 = vmatpush1.bf16.xpose.msra.mxu0 %v1340_v11 }
  0x44   :  { %689 = vmatprep.subr.bf16.mxu1 %v1345_v13  ;;  %929 = vmatprep.subr.bf16.mxu0 %v1348_v14 }
  0x45   :  { %719 = vmatprep.mubr.bf16.mxu1 %v175_v15  ;;  %959 = vmatprep.mubr.bf16.mxu0 %v231_v16 }
  0x4b   :  { %690 = vmatpush1.bf16.xpose.msra.mxu1 %v1343_v17  ;;  %930 = vmatpush1.bf16.xpose.msra.mxu0 %v1346_v18 }
  0x4c   :  { %727 = vmatprep.subr.bf16.mxu1 %v1351_v19  ;;  %967 = vmatprep.subr.bf16.mxu0 %v1355_v20 }
  0x52   :  { %720 = vmatmul.mubr.bf16.vlgmr.msra.gmra.mrb[0].mxu1 %v161_v21  ;;  %960 = vmatmul.mubr.bf16.vlgmr.msra.gmra.mrb[0].mxu0 %v217_v22 }
  0x53   :  { %728 = vmatpush1.bf16.xpose.msra.mxu1 %v1349_v23  ;;  %968 = vmatpush1.bf16.xpose.msra.mxu0 %v1353_v24 }
  0x54   :  { %729 = vmatprep.subr.bf16.mxu1 %v1358_v25  ;;  %969 = vmatprep.subr.bf16.mxu0 %v1361_v26 }
  0x55   :  { %759 = vmatprep.mubr.bf16.mxu1 %v185_v27  ;;  %999 = vmatprep.mubr.bf16.mxu0 %v235_v28 }
  0x5b   :  { %730 = vmatpush1.bf16.xpose.msra.mxu1 %v1356_v29  ;;  %970 = vmatpush1.bf16.xpose.msra.mxu0 %v1359_v30 }
  0x5c   :  { %1211 = vmatprep.subr.bf16.mxu0 %v1389_v31  ;;  %1230 = vmatprep.subr.bf16.mxu1 %v1391_v40 }
  0x62   :  { %760 = vmatmul.mubr.bf16.vlgmr.msra.gmra.mrb[0].mxu1 %v183_v32  ;;  %1000 = vmatmul.mubr.bf16.vlgmr.msra.gmra.mrb[0].mxu0 %v233_v33 }
  0x63   :  { %1212 = vmatpush3.bf16.xpose.msra.mxu0 %v1362_v34  ;;  %1215 = vmatprep.mubr.msk.bf16.mxu0 %vm1390_vm0, %v1389_v31 }
  0x64   :  { %1213 = vmatprep.subr.bf16.mxu0 %v1389_v31  ;;  %1227 = vmatprep.mubr.msk.f32.mxu1 %vm1390_vm0, %v1389_v31 }
  0x65   :  { %1232 = vmatpush3.bf16.msra.mxu1 %v1231_v41 }
  0x66   :  { %1233 = vmatprep.subr.bf16.mxu1 %v1391_v40 }
  0x69   :  { %1235 = vmatpush3.bf16.msra.mxu1 %v1234_v43 }
  0x6b   :  { %1214 = vmatpush3.bf16.xpose.msra.mxu0 %v1363_v35 }
  0x72   :  { %1216 = vmatmul.mubr.bf16.vlgmr.msra.gmra.mrb[0].mxu0 %v249_v37 }
 0x135   :  { %v761_v44 = vpop.f32.mrb[0].mxu1 }
 0x136   :  { %v763_v45 = vpop.f32.mrb[1].mxu1  ;;  %v1236_v49 = vadd.f32 %v1149_v48, %v761_v44 }
 0x137   :  { %v764_v46 = vpop.f32.mrb[2].mxu1 }
 0x138   :  { %v765_v47 = vpop.f32.mrb[3].mxu1 }
 0x145   :  { %v1041_v50 = vpop.f32.mrb[0].mxu0 }
 0x146   :  { %v1237_v51 = vadd.f32 %v1236_v49, %v1041_v50  ;;  %v1217_v52 = vpop.f32.mrb[1].mxu0 }
 0x147   :  { %v1044_v53 = vpop.f32.mrb[2].mxu0 }
 0x148   :  { %v1047_v54 = vmax.f32 %v1237_v51, 0.0  ;;  %v1218_v55 = vpop.f32.mrb[3].mxu0 }
 0x14a   :  { %1228 = vmatmul.mubr.msk.f32.vlgmr.msra.gmra.mrb[4].mxu1 %vm1059_vm1, %v1047_v54 }
 0x21d   :  { %v1129_v57 = vpop.f32.mrb[4].mxu1 }
 0x21e   :  { %v1130_v58 = vadd.f32 %v1201_v56, %v1129_v57  ;;  %v1229_v59 = vpop.f32.mrb[5].mxu1 }
 0x220   :  { %1134 = vst.msk [vmem:[#allocation2] sm:$0x3] %vm1133_vm2, %v1130_v58 }
 0x221   :  { %1375 = shalt.err (!%p1372_p4)
}
 0x222   :  { %s1376_s14 = scalar_lea.hbm %s1646_s5, 32 }
 0x223   :  { %p1377_p5 = scmp.ne.s32.totalorder %s1646_s5, %s1376_s14  ;;  %p1380_p6 = scmp.lt.u32.totalorder %s1376_s14, %s1646_s5 }
 0x225   :  { %p1382_p7 = pnand %p1380_p6, %p1377_p5 }
 0x227   :  { %1385 = shalt.err (!%p1382_p7)
}
 0x228   :  { %1144 = dma.vmem_to_hbm [thread:$0]  %s1142_s11, 32, %s1646_s5, [#allocation3]  }
 0x229   :  { %1386 = dma.done.wait [#allocation3], 32  }
 0x22a   :  { %1387 = vsyncadd [#allocation3], 4294967264 }
 0x22b   :  { %1148 = vsyncpa [#allocation3], 1 }

</bundles_post_ra>
